<compile_context>
chip_gen: v5e
topology: v5e:2x2
jax: 0.10.0
libtpu: 0.0.40
codegen_flags: <defaults>
</compile_context>

<pallas_src>
import functools

import jax
import jax.numpy as jnp
import numpy as np
from jax.experimental import pallas as pl
from jax.experimental.pallas import tpu as pltpu

_LN_EPS = 1e-5


def _round_up(x, m):
    return ((x + m - 1) // m) * m


def _check_layers(layer_sizes):
    sizes = np.array(layer_sizes[:-1], dtype=int)
    diffs = sizes[:-1] - sizes[1:]
    assert (diffs < 0).all(), "Layers don't have increasing sizes."


# ----------------------------------------------------------------------------
# Fused kernel: for each layer  LayerNorm -> Linear (bf16 MXU, f32 acc) -> ReLU
# ----------------------------------------------------------------------------
def _decoder_kernel(real_in_sizes, x_ref, *refs):
    # refs = (gamma_0, beta_0, w_0, b_0, ..., gamma_{L-1}, beta_{L-1}, w_{L-1}, b_{L-1}, out_ref)
    o_ref = refs[-1]
    p_refs = refs[:-1]
    n_layers = len(real_in_sizes)

    # no-op for f32 input, keeps the kernel correct for bf16 activations too
    h = x_ref[...].astype(jnp.float32)                       # (bm, F0_padded)

    for l in range(n_layers):
        g_ref, be_ref, w_ref, b_ref = p_refs[4 * l: 4 * l + 4]
        in_f = real_in_sizes[l]                              # real (unpadded) width
        fp = h.shape[-1]                                     # padded width

        # --- LayerNorm over the real features (biased variance, eps=1e-5). ---
        inv_n = 1.0 / float(in_f)
        mean = jnp.sum(h, axis=-1, keepdims=True) * inv_n    # padded lanes are 0
        centered = h - mean
        if in_f != fp:
            lane = jax.lax.broadcasted_iota(jnp.int32, h.shape, 1)
            centered = jnp.where(lane < in_f, centered, 0.0)
        var = jnp.sum(centered * centered, axis=-1, keepdims=True) * inv_n
        xhat = centered * jax.lax.rsqrt(var + _LN_EPS)
        y = xhat * g_ref[...] + be_ref[...]                  # padded lanes -> 0

        # --- Linear on the MXU: bf16 inputs, f32 accumulation; bias + ReLU. ---
        z = jnp.dot(y.astype(jnp.bfloat16), w_ref[...],
                    preferred_element_type=jnp.float32)
        h = jnp.maximum(z + b_ref[...], 0.0)                 # padded cols stay 0
        # Dropout: inference-mode identity.

    o_ref[...] = h.astype(o_ref.dtype)


# ----------------------------------------------------------------------------
# Parameters
# ----------------------------------------------------------------------------
def init_decoder_params(key, layer_sizes):
    """Raw parameters with PyTorch nn.LayerNorm / nn.Linear shapes (f32, unpadded)."""
    params = []
    for i in range(1, len(layer_sizes)):
        in_f, out_f = layer_sizes[i - 1], layer_sizes[i]
        key, kg, kb, kw, kbi = jax.random.split(key, 5)
        gamma = (jnp.ones((1, in_f), jnp.float32)
                 + 0.01 * jax.random.normal(kg, (1, in_f), jnp.float32))
        beta = 0.01 * jax.random.normal(kb, (1, in_f), jnp.float32)
        bound = 1.0 / float(np.sqrt(in_f))
        w = jax.random.uniform(kw, (out_f, in_f), jnp.float32, -bound, bound)
        b = jax.random.uniform(kbi, (1, out_f), jnp.float32, -bound, bound)
        params.append(dict(gamma=gamma, beta=beta, w_t=w.T, b=b))
    return params


def prepare_decoder_params(params):
    """One-time prep: pad feature dims to multiples of 128 (lane-dense) and
    cast weights to bf16.  Padding is zero so padded lanes stay exactly zero."""
    flat, real_in_sizes, padded_sizes = [], [], []
    for p in params:
        in_f, out_f = p["w_t"].shape
        in_p, out_p = _round_up(in_f, 128), _round_up(out_f, 128)
        real_in_sizes.append(in_f)
        padded_sizes.append((in_p, out_p))
        gamma = jnp.zeros((1, in_p), jnp.float32).at[:, :in_f].set(p["gamma"])
        beta = jnp.zeros((1, in_p), jnp.float32).at[:, :in_f].set(p["beta"])
        w = jnp.zeros((in_p, out_p), jnp.float32).at[:in_f, :out_f].set(
            p["w_t"]).astype(jnp.bfloat16)
        b = jnp.zeros((1, out_p), jnp.float32).at[:, :out_f].set(p["b"])
        flat += [gamma, beta, w, b]
    meta = dict(real_in_sizes=tuple(real_in_sizes),
                padded_sizes=tuple(padded_sizes),
                real_out_f=int(params[-1]["w_t"].shape[1]))
    return flat, meta


# ----------------------------------------------------------------------------
# pallas_call wrapper
# ----------------------------------------------------------------------------
def _choose_block_m(batch):
    # 256-row tiles for big batches; otherwise the smallest 8-aligned tile that
    # still yields >= 2 grid blocks (megacore sharding + DMA/compute overlap).
    if batch >= 512:
        return 256
    return max(8, _round_up(pl.cdiv(batch, 2), 8))


def _build_decoder_call(batch_p, block_m, in0_p, meta, single_buffer_params):
    real_in_sizes = meta["real_in_sizes"]
    padded_sizes = meta["padded_sizes"]
    out_p = padded_sizes[-1][1]

    param_kw = {}
    if single_buffer_params:
        # Constant-index operands never need a second pipeline buffer.
        param_kw = dict(pipeline_mode=pl.Buffered(1))

    in_specs = [pl.BlockSpec((block_m, in0_p), lambda i: (i, 0))]
    for (in_p, o_p) in padded_sizes:
        in_specs += [
            pl.BlockSpec((1, in_p), lambda i: (0, 0), **param_kw),
            pl.BlockSpec((1, in_p), lambda i: (0, 0), **param_kw),
            pl.BlockSpec((in_p, o_p), lambda i: (0, 0), **param_kw),
            pl.BlockSpec((1, o_p), lambda i: (0, 0), **param_kw),
        ]
    out_specs = pl.BlockSpec((block_m, out_p), lambda i: (i, 0))

    # VMEM budget: double-buffered activation tiles + resident parameters,
    # with headroom for compiler-internal scratch.  Clamped to v7x's 64 MiB.
    vmem = 2 * block_m * in0_p * 4 + 2 * block_m * out_p * 4
    pbuf = 1 if single_buffer_params else 2
    for (in_p, o_p) in padded_sizes:
        vmem += pbuf * (2 * in_p * 4 + in_p * o_p * 2 + o_p * 4)
    vmem_limit = int(min(64 * 1024 * 1024, max(16 * 1024 * 1024, 2 * vmem)))

    return pl.pallas_call(
        functools.partial(_decoder_kernel, real_in_sizes),
        out_shape=jax.ShapeDtypeStruct((batch_p, out_p), jnp.float32),
        grid_spec=pl.GridSpec(grid=(batch_p // block_m,),
                              in_specs=in_specs, out_specs=out_specs),
        compiler_params=pltpu.CompilerParams(
            dimension_semantics=("parallel",),
            vmem_limit_bytes=vmem_limit),
    )


def decoder_forward(x, flat_params, meta, *, block_m=None):
    """Fused Pallas forward of the whole Decoder.  x: (B, layer_sizes[0]) f32."""
    B, in0 = x.shape
    assert in0 == meta["real_in_sizes"][0]
    in0_p = meta["padded_sizes"][0][0]
    real_out = meta["real_out_f"]

    if block_m is None:
        block_m = _choose_block_m(B)
    # >= 2 grid blocks so both v7x TensorCores get work.
    batch_p = max(_round_up(B, block_m), 2 * block_m)

    xp = jnp.zeros((batch_p, in0_p), jnp.float32).at[:B, :in0].set(x)

    try:
        call = _build_decoder_call(batch_p, block_m, in0_p, meta,
                                   single_buffer_params=True)
        out = call(xp, *flat_params)
    except Exception:
        # Fallback if this JAX build rejects pipeline_mode on pallas_call specs.
        call = _build_decoder_call(batch_p, block_m, in0_p, meta,
                                   single_buffer_params=False)
        out = call(xp, *flat_params)

    return out[:B, :real_out]


# ----------------------------------------------------------------------------
# Pure-JAX reference (same bf16-matmul / f32-accumulate numerics as the kernel)
# ----------------------------------------------------------------------------
def decoder_reference(x, params):
    for p in params:
        mean = jnp.mean(x, axis=-1, keepdims=True)
        var = jnp.mean((x - mean) ** 2, axis=-1, keepdims=True)
        y = (x - mean) * jax.lax.rsqrt(var + _LN_EPS) * p["gamma"] + p["beta"]
        z = jnp.dot(y.astype(jnp.bfloat16), p["w_t"].astype(jnp.bfloat16),
                    preferred_element_type=jnp.float32) + p["b"]
        x = jnp.maximum(z, 0.0)
    return x


if __name__ == "__main__":
    # Decoder requires increasing sizes among layer_sizes[:-1].
    layer_sizes = [32, 64, 128]
    batch = 8
    _check_layers(layer_sizes)

    key = jax.random.PRNGKey(0)
    key, kx = jax.random.split(key)
    x = jax.random.normal(kx, (batch, layer_sizes[0]), jnp.float32)

    params = init_decoder_params(key, layer_sizes)
    flat_params, meta = prepare_decoder_params(params)

    out = decoder_forward(x, flat_params, meta)
    out = jax.block_until_ready(out)

    ref = decoder_reference(x, params)
    assert out.shape == (batch, layer_sizes[-1])
    max_err = float(jnp.max(jnp.abs(out - ref)))
    assert jnp.allclose(out, ref, atol=2e-3, rtol=2e-3), \
        f"mismatch vs reference (max |err| = {max_err})"

    print("KERNEL_OK")
</pallas_src>

<mosaic_0001>
module attributes {stable_mosaic.version = 11 : i64} {
  func.func @_decoder_kernel(%arg0: i32, %arg1: memref<8x128xf32, #tpu.memory_space<vmem>>, %arg2: memref<1x128xf32, #tpu.memory_space<vmem>>, %arg3: memref<1x128xf32, #tpu.memory_space<vmem>>, %arg4: memref<128x128xbf16, #tpu.memory_space<vmem>>, %arg5: memref<1x128xf32, #tpu.memory_space<vmem>>, %arg6: memref<1x128xf32, #tpu.memory_space<vmem>>, %arg7: memref<1x128xf32, #tpu.memory_space<vmem>>, %arg8: memref<128x128xbf16, #tpu.memory_space<vmem>>, %arg9: memref<1x128xf32, #tpu.memory_space<vmem>>, %arg10: memref<8x128xf32, #tpu.memory_space<vmem>>) attributes {dimension_semantics = [#tpu.dimension_semantics<parallel>], iteration_bounds = array<i64: 2>, scalar_prefetch = 0 : i64, scratch_operands = 0 : i64, tpu.core_type = #tpu.core_type<tc>, window_params = [{transform_indices = @transform_0, window_bounds = array<i64: 8, 128>}, {pipeline_mode = #tpu.pipeline_mode<synchronous>, transform_indices = @transform_1, window_bounds = array<i64: 1, 128>}, {pipeline_mode = #tpu.pipeline_mode<synchronous>, transform_indices = @transform_2, window_bounds = array<i64: 1, 128>}, {pipeline_mode = #tpu.pipeline_mode<synchronous>, transform_indices = @transform_3, window_bounds = array<i64: 128, 128>}, {pipeline_mode = #tpu.pipeline_mode<synchronous>, transform_indices = @transform_4, window_bounds = array<i64: 1, 128>}, {pipeline_mode = #tpu.pipeline_mode<synchronous>, transform_indices = @transform_5, window_bounds = array<i64: 1, 128>}, {pipeline_mode = #tpu.pipeline_mode<synchronous>, transform_indices = @transform_6, window_bounds = array<i64: 1, 128>}, {pipeline_mode = #tpu.pipeline_mode<synchronous>, transform_indices = @transform_7, window_bounds = array<i64: 128, 128>}, {pipeline_mode = #tpu.pipeline_mode<synchronous>, transform_indices = @transform_8, window_bounds = array<i64: 1, 128>}, {transform_indices = @transform_9, window_bounds = array<i64: 8, 128>}]} {
    %c0 = arith.constant 0 : index
    %c0_0 = arith.constant 0 : index
    %0 = vector.load %arg1[%c0, %c0_0] : memref<8x128xf32, #tpu.memory_space<vmem>>, vector<8x128xf32>
    %cst = arith.constant dense<0.000000e+00> : vector<8xf32>
    %1 = vector.multi_reduction <add>, %0, %cst [1] : vector<8x128xf32> to vector<8xf32>
    %2 = vector.shape_cast %1 : vector<8xf32> to vector<8x1xf32>
    %cst_1 = arith.constant 3.125000e-02 : f32
    %3 = vector.broadcast %cst_1 : f32 to vector<8x1xf32>
    %4 = arith.mulf %2, %3 : vector<8x1xf32>
    %5 = vector.broadcast %4 : vector<8x1xf32> to vector<8x128xf32>
    %6 = arith.subf %0, %5 : vector<8x128xf32>
    %7 = tpu.iota {dimensions = array<i32: 1>} : vector<8x128xi32>
    %c32_i32 = arith.constant 32 : i32
    %8 = vector.broadcast %c32_i32 : i32 to vector<8x128xi32>
    %9 = arith.cmpi slt, %7, %8 : vector<8x128xi32>
    %cst_2 = arith.constant 0.000000e+00 : f32
    %10 = vector.broadcast %cst_2 : f32 to vector<8x128xf32>
    %11 = arith.select %9, %6, %10 : vector<8x128xi1>, vector<8x128xf32>
    %12 = arith.mulf %11, %11 : vector<8x128xf32>
    %cst_3 = arith.constant dense<0.000000e+00> : vector<8xf32>
    %13 = vector.multi_reduction <add>, %12, %cst_3 [1] : vector<8x128xf32> to vector<8xf32>
    %14 = vector.shape_cast %13 : vector<8xf32> to vector<8x1xf32>
    %cst_4 = arith.constant 3.125000e-02 : f32
    %15 = vector.broadcast %cst_4 : f32 to vector<8x1xf32>
    %16 = arith.mulf %14, %15 : vector<8x1xf32>
    %cst_5 = arith.constant 9.99999974E-6 : f32
    %17 = vector.broadcast %cst_5 : f32 to vector<8x1xf32>
    %18 = arith.addf %16, %17 : vector<8x1xf32>
    %19 = math.rsqrt %18 : vector<8x1xf32>
    %20 = vector.broadcast %19 : vector<8x1xf32> to vector<8x128xf32>
    %21 = arith.mulf %11, %20 : vector<8x128xf32>
    %c0_6 = arith.constant 0 : index
    %c0_7 = arith.constant 0 : index
    %22 = vector.load %arg2[%c0_6, %c0_7] : memref<1x128xf32, #tpu.memory_space<vmem>>, vector<1x128xf32>
    %23 = vector.broadcast %22 : vector<1x128xf32> to vector<8x128xf32>
    %24 = arith.mulf %21, %23 : vector<8x128xf32>
    %c0_8 = arith.constant 0 : index
    %c0_9 = arith.constant 0 : index
    %25 = vector.load %arg3[%c0_8, %c0_9] : memref<1x128xf32, #tpu.memory_space<vmem>>, vector<1x128xf32>
    %26 = vector.broadcast %25 : vector<1x128xf32> to vector<8x128xf32>
    %27 = arith.addf %24, %26 : vector<8x128xf32>
    %28 = arith.truncf %27 : vector<8x128xf32> to vector<8x128xbf16>
    %c0_10 = arith.constant 0 : index
    %c0_11 = arith.constant 0 : index
    %29 = vector.load %arg4[%c0_10, %c0_11] : memref<128x128xbf16, #tpu.memory_space<vmem>>, vector<128x128xbf16>
    %cst_12 = arith.constant dense<0.000000e+00> : vector<8x128xf32>
    %30 = tpu.matmul %28, %29, %cst_12 {dimension_numbers = #tpu.dot_dimension_numbers<[1], [0], [0], [1], [0, 0, 1, 1], [], []>} : vector<8x128xbf16>, vector<128x128xbf16>, vector<8x128xf32> -> vector<8x128xf32>
    %c0_13 = arith.constant 0 : index
    %c0_14 = arith.constant 0 : index
    %31 = vector.load %arg5[%c0_13, %c0_14] : memref<1x128xf32, #tpu.memory_space<vmem>>, vector<1x128xf32>
    %32 = vector.broadcast %31 : vector<1x128xf32> to vector<8x128xf32>
    %33 = arith.addf %30, %32 : vector<8x128xf32>
    %cst_15 = arith.constant 0.000000e+00 : f32
    %34 = vector.broadcast %cst_15 : f32 to vector<8x128xf32>
    %35 = arith.maximumf %33, %34 : vector<8x128xf32>
    %cst_16 = arith.constant dense<0.000000e+00> : vector<8xf32>
    %36 = vector.multi_reduction <add>, %35, %cst_16 [1] : vector<8x128xf32> to vector<8xf32>
    %37 = vector.shape_cast %36 : vector<8xf32> to vector<8x1xf32>
    %cst_17 = arith.constant 1.562500e-02 : f32
    %38 = vector.broadcast %cst_17 : f32 to vector<8x1xf32>
    %39 = arith.mulf %37, %38 : vector<8x1xf32>
    %40 = vector.broadcast %39 : vector<8x1xf32> to vector<8x128xf32>
    %41 = arith.subf %35, %40 : vector<8x128xf32>
    %42 = tpu.iota {dimensions = array<i32: 1>} : vector<8x128xi32>
    %c64_i32 = arith.constant 64 : i32
    %43 = vector.broadcast %c64_i32 : i32 to vector<8x128xi32>
    %44 = arith.cmpi slt, %42, %43 : vector<8x128xi32>
    %cst_18 = arith.constant 0.000000e+00 : f32
    %45 = vector.broadcast %cst_18 : f32 to vector<8x128xf32>
    %46 = arith.select %44, %41, %45 : vector<8x128xi1>, vector<8x128xf32>
    %47 = arith.mulf %46, %46 : vector<8x128xf32>
    %cst_19 = arith.constant dense<0.000000e+00> : vector<8xf32>
    %48 = vector.multi_reduction <add>, %47, %cst_19 [1] : vector<8x128xf32> to vector<8xf32>
    %49 = vector.shape_cast %48 : vector<8xf32> to vector<8x1xf32>
    %cst_20 = arith.constant 1.562500e-02 : f32
    %50 = vector.broadcast %cst_20 : f32 to vector<8x1xf32>
    %51 = arith.mulf %49, %50 : vector<8x1xf32>
    %cst_21 = arith.constant 9.99999974E-6 : f32
    %52 = vector.broadcast %cst_21 : f32 to vector<8x1xf32>
    %53 = arith.addf %51, %52 : vector<8x1xf32>
    %54 = math.rsqrt %53 : vector<8x1xf32>
    %55 = vector.broadcast %54 : vector<8x1xf32> to vector<8x128xf32>
    %56 = arith.mulf %46, %55 : vector<8x128xf32>
    %c0_22 = arith.constant 0 : index
    %c0_23 = arith.constant 0 : index
    %57 = vector.load %arg6[%c0_22, %c0_23] : memref<1x128xf32, #tpu.memory_space<vmem>>, vector<1x128xf32>
    %58 = vector.broadcast %57 : vector<1x128xf32> to vector<8x128xf32>
    %59 = arith.mulf %56, %58 : vector<8x128xf32>
    %c0_24 = arith.constant 0 : index
    %c0_25 = arith.constant 0 : index
    %60 = vector.load %arg7[%c0_24, %c0_25] : memref<1x128xf32, #tpu.memory_space<vmem>>, vector<1x128xf32>
    %61 = vector.broadcast %60 : vector<1x128xf32> to vector<8x128xf32>
    %62 = arith.addf %59, %61 : vector<8x128xf32>
    %63 = arith.truncf %62 : vector<8x128xf32> to vector<8x128xbf16>
    %c0_26 = arith.constant 0 : index
    %c0_27 = arith.constant 0 : index
    %64 = vector.load %arg8[%c0_26, %c0_27] : memref<128x128xbf16, #tpu.memory_space<vmem>>, vector<128x128xbf16>
    %cst_28 = arith.constant dense<0.000000e+00> : vector<8x128xf32>
    %65 = tpu.matmul %63, %64, %cst_28 {dimension_numbers = #tpu.dot_dimension_numbers<[1], [0], [0], [1], [0, 0, 1, 1], [], []>} : vector<8x128xbf16>, vector<128x128xbf16>, vector<8x128xf32> -> vector<8x128xf32>
    %c0_29 = arith.constant 0 : index
    %c0_30 = arith.constant 0 : index
    %66 = vector.load %arg9[%c0_29, %c0_30] : memref<1x128xf32, #tpu.memory_space<vmem>>, vector<1x128xf32>
    %67 = vector.broadcast %66 : vector<1x128xf32> to vector<8x128xf32>
    %68 = arith.addf %65, %67 : vector<8x128xf32>
    %cst_31 = arith.constant 0.000000e+00 : f32
    %69 = vector.broadcast %cst_31 : f32 to vector<8x128xf32>
    %70 = arith.maximumf %68, %69 : vector<8x128xf32>
    %c0_32 = arith.constant 0 : index
    %c0_33 = arith.constant 0 : index
    %71 = vector.load %arg10[%c0_32, %c0_33] : memref<8x128xf32, #tpu.memory_space<vmem>>, vector<8x128xf32>
    tpu.vector_store %arg10[%c0_32, %c0_33], %70 {strides = array<i32>} : memref<8x128xf32, #tpu.memory_space<vmem>>, vector<8x128xf32>,
    return
  }
  func.func @transform_0(%arg0: i32) -> (i32, i32) {
    %c0_i32 = arith.constant 0 : i32
    %c0_i32_0 = arith.constant 0 : i32
    return %arg0, %c0_i32 : i32, i32
  }
  func.func @transform_1(%arg0: i32) -> (i32, i32) {
    %c0_i32 = arith.constant 0 : i32
    %c0_i32_0 = arith.constant 0 : i32
    %c0_i32_1 = arith.constant 0 : i32
    return %c0_i32, %c0_i32_0 : i32, i32
  }
  func.func @transform_2(%arg0: i32) -> (i32, i32) {
    %c0_i32 = arith.constant 0 : i32
    %c0_i32_0 = arith.constant 0 : i32
    %c0_i32_1 = arith.constant 0 : i32
    return %c0_i32, %c0_i32_0 : i32, i32
  }
  func.func @transform_3(%arg0: i32) -> (i32, i32) {
    %c0_i32 = arith.constant 0 : i32
    %c0_i32_0 = arith.constant 0 : i32
    %c0_i32_1 = arith.constant 0 : i32
    return %c0_i32, %c0_i32_0 : i32, i32
  }
  func.func @transform_4(%arg0: i32) -> (i32, i32) {
    %c0_i32 = arith.constant 0 : i32
    %c0_i32_0 = arith.constant 0 : i32
    %c0_i32_1 = arith.constant 0 : i32
    return %c0_i32, %c0_i32_0 : i32, i32
  }
  func.func @transform_5(%arg0: i32) -> (i32, i32) {
    %c0_i32 = arith.constant 0 : i32
    %c0_i32_0 = arith.constant 0 : i32
    %c0_i32_1 = arith.constant 0 : i32
    return %c0_i32, %c0_i32_0 : i32, i32
  }
  func.func @transform_6(%arg0: i32) -> (i32, i32) {
    %c0_i32 = arith.constant 0 : i32
    %c0_i32_0 = arith.constant 0 : i32
    %c0_i32_1 = arith.constant 0 : i32
    return %c0_i32, %c0_i32_0 : i32, i32
  }
  func.func @transform_7(%arg0: i32) -> (i32, i32) {
    %c0_i32 = arith.constant 0 : i32
    %c0_i32_0 = arith.constant 0 : i32
    %c0_i32_1 = arith.constant 0 : i32
    return %c0_i32, %c0_i32_0 : i32, i32
  }
  func.func @transform_8(%arg0: i32) -> (i32, i32) {
    %c0_i32 = arith.constant 0 : i32
    %c0_i32_0 = arith.constant 0 : i32
    %c0_i32_1 = arith.constant 0 : i32
    return %c0_i32, %c0_i32_0 : i32, i32
  }
  func.func @transform_9(%arg0: i32) -> (i32, i32) {
    %c0_i32 = arith.constant 0 : i32
    %c0_i32_0 = arith.constant 0 : i32
    return %arg0, %c0_i32 : i32, i32
  }
}

module attributes {stable_mosaic.version = 11 : i64} {
  func.func @_decoder_kernel(%arg0: i32, %arg1: memref<8x128xf32, #tpu.memory_space<vmem>>, %arg2: memref<1x128xf32, #tpu.memory_space<vmem>>, %arg3: memref<1x128xf32, #tpu.memory_space<vmem>>, %arg4: memref<128x128xbf16, #tpu.memory_space<vmem>>, %arg5: memref<1x128xf32, #tpu.memory_space<vmem>>, %arg6: memref<1x128xf32, #tpu.memory_space<vmem>>, %arg7: memref<1x128xf32, #tpu.memory_space<vmem>>, %arg8: memref<128x128xbf16, #tpu.memory_space<vmem>>, %arg9: memref<1x128xf32, #tpu.memory_space<vmem>>, %arg10: memref<8x128xf32, #tpu.memory_space<vmem>>) attributes {dimension_semantics = [#tpu.dimension_semantics<parallel>], iteration_bounds = array<i64: 2>, scalar_prefetch = 0 : i64, scratch_operands = 0 : i64, tpu.core_type = #tpu.core_type<tc>, window_params = [{transform_indices = @transform_0, window_bounds = array<i64: 8, 128>}, {pipeline_mode = #tpu.pipeline_mode<synchronous>, transform_indices = @transform_1, window_bounds = array<i64: 1, 128>}, {pipeline_mode = #tpu.pipeline_mode<synchronous>, transform_indices = @transform_2, window_bounds = array<i64: 1, 128>}, {pipeline_mode = #tpu.pipeline_mode<synchronous>, transform_indices = @transform_3, window_bounds = array<i64: 128, 128>}, {pipeline_mode = #tpu.pipeline_mode<synchronous>, transform_indices = @transform_4, window_bounds = array<i64: 1, 128>}, {pipeline_mode = #tpu.pipeline_mode<synchronous>, transform_indices = @transform_5, window_bounds = array<i64: 1, 128>}, {pipeline_mode = #tpu.pipeline_mode<synchronous>, transform_indices = @transform_6, window_bounds = array<i64: 1, 128>}, {pipeline_mode = #tpu.pipeline_mode<synchronous>, transform_indices = @transform_7, window_bounds = array<i64: 128, 128>}, {pipeline_mode = #tpu.pipeline_mode<synchronous>, transform_indices = @transform_8, window_bounds = array<i64: 1, 128>}, {transform_indices = @transform_9, window_bounds = array<i64: 8, 128>}]} {
    %c0 = arith.constant 0 : index
    %c0_0 = arith.constant 0 : index
    %0 = vector.load %arg1[%c0, %c0_0] : memref<8x128xf32, #tpu.memory_space<vmem>>, vector<8x128xf32>
    %cst = arith.constant dense<0.000000e+00> : vector<8xf32>
    %1 = vector.multi_reduction <add>, %0, %cst [1] : vector<8x128xf32> to vector<8xf32>
    %2 = vector.shape_cast %1 : vector<8xf32> to vector<8x1xf32>
    %cst_1 = arith.constant 3.125000e-02 : f32
    %3 = vector.broadcast %cst_1 : f32 to vector<8x1xf32>
    %4 = arith.mulf %2, %3 : vector<8x1xf32>
    %5 = vector.broadcast %4 : vector<8x1xf32> to vector<8x128xf32>
    %6 = arith.subf %0, %5 : vector<8x128xf32>
    %7 = tpu.iota {dimensions = array<i32: 1>} : vector<8x128xi32>
    %c32_i32 = arith.constant 32 : i32
    %8 = vector.broadcast %c32_i32 : i32 to vector<8x128xi32>
    %9 = arith.cmpi slt, %7, %8 : vector<8x128xi32>
    %cst_2 = arith.constant 0.000000e+00 : f32
    %10 = vector.broadcast %cst_2 : f32 to vector<8x128xf32>
    %11 = arith.select %9, %6, %10 : vector<8x128xi1>, vector<8x128xf32>
    %12 = arith.mulf %11, %11 : vector<8x128xf32>
    %cst_3 = arith.constant dense<0.000000e+00> : vector<8xf32>
    %13 = vector.multi_reduction <add>, %12, %cst_3 [1] : vector<8x128xf32> to vector<8xf32>
    %14 = vector.shape_cast %13 : vector<8xf32> to vector<8x1xf32>
    %cst_4 = arith.constant 3.125000e-02 : f32
    %15 = vector.broadcast %cst_4 : f32 to vector<8x1xf32>
    %16 = arith.mulf %14, %15 : vector<8x1xf32>
    %cst_5 = arith.constant 9.99999974E-6 : f32
    %17 = vector.broadcast %cst_5 : f32 to vector<8x1xf32>
    %18 = arith.addf %16, %17 : vector<8x1xf32>
    %19 = math.rsqrt %18 : vector<8x1xf32>
    %20 = vector.broadcast %19 : vector<8x1xf32> to vector<8x128xf32>
    %21 = arith.mulf %11, %20 : vector<8x128xf32>
    %c0_6 = arith.constant 0 : index
    %c0_7 = arith.constant 0 : index
    %22 = vector.load %arg2[%c0_6, %c0_7] : memref<1x128xf32, #tpu.memory_space<vmem>>, vector<1x128xf32>
    %23 = vector.broadcast %22 : vector<1x128xf32> to vector<8x128xf32>
    %24 = arith.mulf %21, %23 : vector<8x128xf32>
    %c0_8 = arith.constant 0 : index
    %c0_9 = arith.constant 0 : index
    %25 = vector.load %arg3[%c0_8, %c0_9] : memref<1x128xf32, #tpu.memory_space<vmem>>, vector<1x128xf32>
    %26 = vector.broadcast %25 : vector<1x128xf32> to vector<8x128xf32>
    %27 = arith.addf %24, %26 : vector<8x128xf32>
    %28 = arith.truncf %27 : vector<8x128xf32> to vector<8x128xbf16>
    %c0_10 = arith.constant 0 : index
    %c0_11 = arith.constant 0 : index
    %29 = vector.load %arg4[%c0_10, %c0_11] : memref<128x128xbf16, #tpu.memory_space<vmem>>, vector<128x128xbf16>
    %cst_12 = arith.constant dense<0.000000e+00> : vector<8x128xf32>
    %30 = tpu.matmul %28, %29, %cst_12 {dimension_numbers = #tpu.dot_dimension_numbers<[1], [0], [0], [1], [0, 0, 1, 1], [], []>} : vector<8x128xbf16>, vector<128x128xbf16>, vector<8x128xf32> -> vector<8x128xf32>
    %c0_13 = arith.constant 0 : index
    %c0_14 = arith.constant 0 : index
    %31 = vector.load %arg5[%c0_13, %c0_14] : memref<1x128xf32, #tpu.memory_space<vmem>>, vector<1x128xf32>
    %32 = vector.broadcast %31 : vector<1x128xf32> to vector<8x128xf32>
    %33 = arith.addf %30, %32 : vector<8x128xf32>
    %cst_15 = arith.constant 0.000000e+00 : f32
    %34 = vector.broadcast %cst_15 : f32 to vector<8x128xf32>
    %35 = arith.maximumf %33, %34 : vector<8x128xf32>
    %cst_16 = arith.constant dense<0.000000e+00> : vector<8xf32>
    %36 = vector.multi_reduction <add>, %35, %cst_16 [1] : vector<8x128xf32> to vector<8xf32>
    %37 = vector.shape_cast %36 : vector<8xf32> to vector<8x1xf32>
    %cst_17 = arith.constant 1.562500e-02 : f32
    %38 = vector.broadcast %cst_17 : f32 to vector<8x1xf32>
    %39 = arith.mulf %37, %38 : vector<8x1xf32>
    %40 = vector.broadcast %39 : vector<8x1xf32> to vector<8x128xf32>
    %41 = arith.subf %35, %40 : vector<8x128xf32>
    %42 = tpu.iota {dimensions = array<i32: 1>} : vector<8x128xi32>
    %c64_i32 = arith.constant 64 : i32
    %43 = vector.broadcast %c64_i32 : i32 to vector<8x128xi32>
    %44 = arith.cmpi slt, %42, %43 : vector<8x128xi32>
    %cst_18 = arith.constant 0.000000e+00 : f32
    %45 = vector.broadcast %cst_18 : f32 to vector<8x128xf32>
    %46 = arith.select %44, %41, %45 : vector<8x128xi1>, vector<8x128xf32>
    %47 = arith.mulf %46, %46 : vector<8x128xf32>
    %cst_19 = arith.constant dense<0.000000e+00> : vector<8xf32>
    %48 = vector.multi_reduction <add>, %47, %cst_19 [1] : vector<8x128xf32> to vector<8xf32>
    %49 = vector.shape_cast %48 : vector<8xf32> to vector<8x1xf32>
    %cst_20 = arith.constant 1.562500e-02 : f32
    %50 = vector.broadcast %cst_20 : f32 to vector<8x1xf32>
    %51 = arith.mulf %49, %50 : vector<8x1xf32>
    %cst_21 = arith.constant 9.99999974E-6 : f32
    %52 = vector.broadcast %cst_21 : f32 to vector<8x1xf32>
    %53 = arith.addf %51, %52 : vector<8x1xf32>
    %54 = math.rsqrt %53 : vector<8x1xf32>
    %55 = vector.broadcast %54 : vector<8x1xf32> to vector<8x128xf32>
    %56 = arith.mulf %46, %55 : vector<8x128xf32>
    %c0_22 = arith.constant 0 : index
    %c0_23 = arith.constant 0 : index
    %57 = vector.load %arg6[%c0_22, %c0_23] : memref<1x128xf32, #tpu.memory_space<vmem>>, vector<1x128xf32>
    %58 = vector.broadcast %57 : vector<1x128xf32> to vector<8x128xf32>
    %59 = arith.mulf %56, %58 : vector<8x128xf32>
    %c0_24 = arith.constant 0 : index
    %c0_25 = arith.constant 0 : index
    %60 = vector.load %arg7[%c0_24, %c0_25] : memref<1x128xf32, #tpu.memory_space<vmem>>, vector<1x128xf32>
    %61 = vector.broadcast %60 : vector<1x128xf32> to vector<8x128xf32>
    %62 = arith.addf %59, %61 : vector<8x128xf32>
    %63 = arith.truncf %62 : vector<8x128xf32> to vector<8x128xbf16>
    %c0_26 = arith.constant 0 : index
    %c0_27 = arith.constant 0 : index
    %64 = vector.load %arg8[%c0_26, %c0_27] : memref<128x128xbf16, #tpu.memory_space<vmem>>, vector<128x128xbf16>
    %cst_28 = arith.constant dense<0.000000e+00> : vector<8x128xf32>
    %65 = tpu.matmul %63, %64, %cst_28 {dimension_numbers = #tpu.dot_dimension_numbers<[1], [0], [0], [1], [0, 0, 1, 1], [], []>} : vector<8x128xbf16>, vector<128x128xbf16>, vector<8x128xf32> -> vector<8x128xf32>
    %c0_29 = arith.constant 0 : index
    %c0_30 = arith.constant 0 : index
    %66 = vector.load %arg9[%c0_29, %c0_30] : memref<1x128xf32, #tpu.memory_space<vmem>>, vector<1x128xf32>
    %67 = vector.broadcast %66 : vector<1x128xf32> to vector<8x128xf32>
    %68 = arith.addf %65, %67 : vector<8x128xf32>
    %cst_31 = arith.constant 0.000000e+00 : f32
    %69 = vector.broadcast %cst_31 : f32 to vector<8x128xf32>
    %70 = arith.maximumf %68, %69 : vector<8x128xf32>
    %c0_32 = arith.constant 0 : index
    %c0_33 = arith.constant 0 : index
    %71 = vector.load %arg10[%c0_32, %c0_33] : memref<8x128xf32, #tpu.memory_space<vmem>>, vector<8x128xf32>
    tpu.vector_store %arg10[%c0_32, %c0_33], %70 {strides = array<i32>} : memref<8x128xf32, #tpu.memory_space<vmem>>, vector<8x128xf32>,
    return
  }
  func.func @transform_0(%arg0: i32) -> (i32, i32) {
    %c0_i32 = arith.constant 0 : i32
    %c0_i32_0 = arith.constant 0 : i32
    return %arg0, %c0_i32 : i32, i32
  }
  func.func @transform_1(%arg0: i32) -> (i32, i32) {
    %c0_i32 = arith.constant 0 : i32
    %c0_i32_0 = arith.constant 0 : i32
    %c0_i32_1 = arith.constant 0 : i32
    return %c0_i32, %c0_i32_0 : i32, i32
  }
  func.func @transform_2(%arg0: i32) -> (i32, i32) {
    %c0_i32 = arith.constant 0 : i32
    %c0_i32_0 = arith.constant 0 : i32
    %c0_i32_1 = arith.constant 0 : i32
    return %c0_i32, %c0_i32_0 : i32, i32
  }
  func.func @transform_3(%arg0: i32) -> (i32, i32) {
    %c0_i32 = arith.constant 0 : i32
    %c0_i32_0 = arith.constant 0 : i32
    %c0_i32_1 = arith.constant 0 : i32
    return %c0_i32, %c0_i32_0 : i32, i32
  }
  func.func @transform_4(%arg0: i32) -> (i32, i32) {
    %c0_i32 = arith.constant 0 : i32
    %c0_i32_0 = arith.constant 0 : i32
    %c0_i32_1 = arith.constant 0 : i32
    return %c0_i32, %c0_i32_0 : i32, i32
  }
  func.func @transform_5(%arg0: i32) -> (i32, i32) {
    %c0_i32 = arith.constant 0 : i32
    %c0_i32_0 = arith.constant 0 : i32
    %c0_i32_1 = arith.constant 0 : i32
    return %c0_i32, %c0_i32_0 : i32, i32
  }
  func.func @transform_6(%arg0: i32) -> (i32, i32) {
    %c0_i32 = arith.constant 0 : i32
    %c0_i32_0 = arith.constant 0 : i32
    %c0_i32_1 = arith.constant 0 : i32
    return %c0_i32, %c0_i32_0 : i32, i32
  }
  func.func @transform_7(%arg0: i32) -> (i32, i32) {
    %c0_i32 = arith.constant 0 : i32
    %c0_i32_0 = arith.constant 0 : i32
    %c0_i32_1 = arith.constant 0 : i32
    return %c0_i32, %c0_i32_0 : i32, i32
  }
  func.func @transform_8(%arg0: i32) -> (i32, i32) {
    %c0_i32 = arith.constant 0 : i32
    %c0_i32_0 = arith.constant 0 : i32
    %c0_i32_1 = arith.constant 0 : i32
    return %c0_i32, %c0_i32_0 : i32, i32
  }
  func.func @transform_9(%arg0: i32) -> (i32, i32) {
    %c0_i32 = arith.constant 0 : i32
    %c0_i32_0 = arith.constant 0 : i32
    return %arg0, %c0_i32 : i32, i32
  }
}

</mosaic_0001>

<bundles_post_ra>
// kernel: tpu_custom_call.1
= control target key start
LH: loop header
LB: loop body
LE: loop exit
PB: predicated region body
PF: predicated region fallthrough
CT: control target
= control target key end

     0   :  { %s1362_s0 = inlined_call_operand.hbm [shape: f32[16,128], index: 0, kind: input, shape index: {}]   ;;  %s1363_s1 = inlined_call_operand.hbm [shape: f32[1,128], index: 1, kind: input, shape index: {}]   ;;  %s1364_s2 = inlined_call_operand.vmem [shape: f32[1,128], index: 2, kind: input, shape index: {}]   ;;  %s1365_s3 = inlined_call_operand.hbm [shape: bf16[128,128], index: 3, kind: input, shape index: {}]   ;;  %s1366_s4 = inlined_call_operand.vmem [shape: f32[1,128], index: 4, kind: input, shape index: {}]   ;;  %s1367_s5 = inlined_call_operand.vmem [shape: f32[1,128], index: 5, kind: input, shape index: {}]   ;;  %s1368_s6 = inlined_call_operand.vmem [shape: f32[1,128], index: 6, kind: input, shape index: {}]   ;;  %s1369_s7 = inlined_call_operand.hbm [shape: bf16[128,128], index: 7, kind: input, shape index: {}]   ;;  %s1370_s8 = inlined_call_operand.vmem [shape: f32[1,128], index: 8, kind: input, shape index: {}]   ;;  %s1371_s9 = inlined_call_operand.hbm [shape: f32[16,128], index: 9, kind: output, shape index: {}]  }
   0x1   :  { %1372 = sst [smem:[#allocation15_spill]] %s1363_s1 }
   0x2   :  { %1373 = sst [smem:[#allocation16_spill]] %s1365_s3 }
   0x3   :  { %1374 = sst [smem:[#allocation17_spill]] %s1369_s7 }
   0x4   :  { %14 = vsyncpa [#allocation3], 0 }
   0x5   :  { %16 = vsyncpa [#allocation3 + $0x1], 0 }
   0x6   :  { %17 = vsyncpa [#allocation6], 0 }
   0x7   :  { %18 = vsyncpa [#allocation9], 0 }
   0x8   :  { %19 = vsyncpa [#allocation4], 0 }
   0x9   :  { %21 = vsyncpa [#allocation4 + $0x1], 0  ;;  %s1185_s30 = smov 0   ;;  %s1187_s10 = smov 0  }
   0xa   :  { %s1189_s11 = smov 0   ;;  %s1191_s12 = smov 0  }
   0xb LB: > { %s1206_s13 = sadd.s32 4294967295, %s1128_s12   ;;  %s747_s14 = sadd.s32 4294967294, %s1128_s12   ;;  %s1128_s12 = sphi %s1191_s12, %s1388_s12   ;;  %s1124_s11 = sphi %s1189_s11, %s1387_s11   ;;  %s1120_s10 = sphi %s1187_s10, %s1386_s10   ;;  %s1116_s30 = sphi %s1185_s30, %s1385_s30  }
   0xc   : > { %p47_p0 = scmp.ne.s32.totalorder %s1120_s10, %s1116_s30  ;;  %p48_p1 = scmp.eq.s32.totalorder %s1206_s13, 0 }
   0xd   : > { %p239_p2 = scmp.eq.s32.totalorder %s1206_s13, 1  ;;  %p245_p3 = scmp.eq.s32.totalorder %s747_s14, 1 }
   0xe   : > { %p1215_p4 = por %p48_p1, %p47_p0  ;;  %p748_p5 = scmp.ge.s32.totalorder %s1128_s12, 1 }
   0xf   : > { %p1220_p6 = por %p245_p3, %p47_p0  ;;  %p252_p7 = scmp.lt.s32.totalorder %s1128_s12, 3 }
  0x10   : > { %s1377_s1 = sld [smem:[#allocation15_spill]]  ;;  %s1130_s21 = smov [#allocation5]  }
  0x11   : > { %p1228_p8 = pnand %p748_p5, %p252_p7  ;;  %s266_s22 = sshll.u32 %s1130_s21, 4  ;;  %s267_s22 = int_to_ptr.vmem [resolvable:$true] %s266_s22 }
  0x12   : > { %s1379_s3 = sld [smem:[#allocation16_spill]]  ;;  %s1131_s27 = smov [#allocation7]  }
  0x13   : > { %p861_p10 = pneg %p1228_p8  ;;  %s280_s28 = sshll.u32 %s1131_s27, 4  ;;  %s281_s28 = int_to_ptr.vmem [resolvable:$true] %s280_s28 }
  0x14   : > { %s1132_s29 = smov 64   ;;  %s1133_s14 = smov 4  }
  0x15   : > { %p1240_p11 = pnand %p861_p10, %p48_p1  ;;  %s1381_s7 = sld [smem:[#allocation17_spill]] }
  0x16   : > { %s264_s19 = sshll.u32 %s1377_s1, 4  ;;  %s1134_s23 = smov [#allocation8]   ;;  %s265_s19 = int_to_ptr.hbm [resolvable:$true] %s264_s19 }
  0x17   : > { %864 = dma.hbm_to_vmem [thread:$0]  (!%p1240_p11), %s265_s19, 16, %s267_s22, [#allocation6]  }
  0x18   : > { %s278_s25 = sshll.u32 %s1379_s3, 4  ;;  %s303_s24 = sshll.u32 %s1134_s23, 4  ;;  %s279_s25 = int_to_ptr.hbm [resolvable:$true] %s278_s25  ;;  %s304_s24 = int_to_ptr.vmem [resolvable:$true] %s303_s24 }
  0x19   : > { %867 = dma.hbm_to_vmem [thread:$0]  (!%p1240_p11), %s279_s25, 1024, %s281_s28, [#allocation6], %s1132_s29, %s1132_s29, %s1133_s14  }
  0x1a   : > { %s1254_s19 = sadd.s32 1, %s1128_s12   ;;  %s34_s27 = sadd.s32 1, %s1124_s11 }
  0x1b   : > { %s301_s21 = sshll.u32 %s1381_s7, 4  ;;  %s31_s22 = ssub.s32 %s1128_s12, %s1254_s19  ;;  %s302_s21 = int_to_ptr.hbm [resolvable:$true] %s301_s21 }
  0x1c   : > { %870 = dma.hbm_to_vmem [thread:$0]  (!%p1240_p11), %s302_s21, 1024, %s304_s24, [#allocation9], %s1132_s29, %s1132_s29, %s1133_s14  }
  0x1d   : > { %p32_p12 = scmp.eq.s32.totalorder %s31_s22, 0  ;;  %p41_p13 = scmp.ne.s32.totalorder %s1124_s11, %s1120_s10 }
  0x1e   : > { %p42_p0 = scmp.eq.s32.totalorder %s1128_s12, 0  ;;  %p882_p5 = scmp.lt.s32.totalorder %s1128_s12, 2 }
  0x1f   : > { %s1263_s25 = scalar_select %p32_p12, %s1124_s11, %s34_s27  }
  0x20   : > { %p1267_p3 = por %p239_p2, %p41_p13  ;;  %s320_s17 = sand.u32 1, %s1124_s11  }
  0x21   : > { %s754_s18 = sshll.u32 %s1128_s12, 3  ;;  %p43_p7 = por %p42_p0, %p41_p13 }
  0x22   : > { %s753_s26 = sshll.u32 %s320_s17, 3  ;;  %s328_s21 = scalar_lea.hbm %s1362_s0, %s754_s18 }
  0x23   : > { %s330_s23 = sshll.u32 %s328_s21, 4  ;;  %s324_s24 = scalar_lea.vmem [#allocation2], %s753_s26  ;;  %s331_s23 = int_to_ptr.hbm [resolvable:$true] %s330_s23 }
  0x24   : > { %s332_s22 = sshll.u32 %s324_s24, 4  ;;  %p1277_p10 = pnand %p882_p5, %p43_p7  ;;  %s333_s22 = int_to_ptr.vmem [resolvable:$true] %s332_s22 }
  0x25   : > { %s321_s1 = scalar_lea.sflag [#allocation3], %s320_s17  ;;  %s1024_s3 = sshra.s32 %s331_s23, 4  ;;  %s1025_s3 = int_to_ptr.hbm [resolvable:$true] %s1024_s3 }
  0x26   : > { %s1026_s7 = scalar_lea.hbm %s1025_s3, 8  ;;  %p1028_p11 = pneg %p1277_p10 }
  0x27   : > { %p1027_p2 = scmp.ne.s32.totalorder %s1025_s3, %s1026_s7  ;;  %s1031_s26 = scalar_lea.hbm %s1362_s0, 16 }
  0x28   : > { %p1032_p0 = scmp.lt.s32.totalorder %s1025_s3, %s1362_s0  ;;  %p1033_p5 = scmp.lt.s32.totalorder %s1031_s26, %s1026_s7 }
  0x29   : > { %p1029_p12 = pnand %p1028_p11, %p1027_p2 }
  0x2a   : > { %p1034_p7 = por %p1033_p5, %p1032_p0 }
  0x2b   : > { %p1030_p13 = pneg %p1029_p12 }
  0x2d   : > { %p1035_p9 = pnand %p1034_p7, %p1030_p13 }
  0x2f   : > { %1038 = shalt.err (!%p1035_p9)
}
  0x30   : > { %874 = dma.hbm_to_vmem [thread:$0]  (!%p1277_p10), %s331_s23, 128, %s333_s22, %s321_s1  }
  0x31   : > { %341 = sbr.rel (%p1228_p8) target bundleno = 862 (0x35e), region = 56  ;;  %s1294_s17 = sand.u32 (!%p1228_p8), 1, %s1120_s10  }
  0x32   : > { %s756_s24 = sshll.u32 (!%p1228_p8), %s1294_s17, 3  ;;  %s344_s18 = scalar_lea.sflag (!%p1228_p8), [#allocation3], %s1294_s17 }
  0x33   : > { %s347_s3 = scalar_lea.vmem (!%p1228_p8), [#allocation2], %s756_s24 }
  0x36   : > { %1099 = dma.done.wait (%p1215_p4), %s344_s18, 128  }
  0x37   : > { %1101 = vsyncadd (%p1215_p4), %s344_s18, 4294967168 }
  0x38   : > { %1103 = dma.done.wait (%p48_p1), [#allocation6], 1040  }
  0x39   : > { %1105 = vsyncadd (%p48_p1), [#allocation6], 4294966256 }
  0x3a   : > { %1107 = dma.done.wait (%p48_p1), [#allocation9], 1024  }
  0x3b   : > { %1109 = vsyncadd (%p48_p1), [#allocation9], 4294966272  ;;  %v398_v0 = vld [vmem:[%s347_s3] sm:$0xff]  ;;  %v403_v2 = vlaneseq  ;;  %v833_v11 = vld [vmem:[#allocation7 + $0x20] sm:$0xff]  ;;  %s826_s26 = sshll.u32 %s1206_s13, 3  ;;  %s397_s7 = scalar_lea.vmem [#allocation10], %s756_s24 }
  0x3c   : > { %399 = vadd.xlane.f32.xlu0 %v398_v0  ;;  %v836_v1 = vld [vmem:[#allocation7 + $0x38] sm:$0xff]  ;;  %v835_v9 = vld [vmem:[#allocation7 + $0x30] sm:$0xff]  ;;  %v834_v10 = vld [vmem:[#allocation7 + $0x28] sm:$0xff]  ;;  %s643_s1 = scalar_lea.hbm %s1371_s9, %s826_s26  ;;  %s645_s15 = sshll.u32 %s397_s7, 4  ;;  %s646_s15 = int_to_ptr.vmem [resolvable:$true] %s645_s15 }
  0x3d   : > { %502 = vmatpush.bf16.msra.mxu0 %v836_v1  ;;  %v404_v3 = vand.u32 127, %v403_v2  ;;  %v832_v12 = vld [vmem:[#allocation7 + $0x18] sm:$0xff]  ;;  %v831_v13 = vld [vmem:[#allocation7 + $0x10] sm:$0xff]  ;;  %v830_v14 = vld [vmem:[#allocation7 + $0x8] sm:$0xff]  ;;  %s647_s20 = sshll.u32 %s643_s1, 4  ;;  %s633_s13 = scalar_lea.sflag [#allocation4], %s1294_s17  ;;  %s648_s20 = int_to_ptr.hbm [resolvable:$true] %s647_s20 }
  0x3e   : > { %v829_v15 = vld [vmem:[#allocation7] sm:$0xff]  ;;  %v924_v25 = vld [vmem:[#allocation5] ss:$0 sm:$0xff]  ;;  %v925_v28 = vld [vmem:[%s1364_s2] ss:$0 sm:$0xff]  ;;  %s1068_s23 = sshra.s32 %s648_s20, 4  ;;  %s1069_s23 = int_to_ptr.hbm [resolvable:$true] %s1068_s23 }
  0x3f   : > { %vm405_vm0 = vcmp.lt.s32.totalorder %v404_v3, 32  ;;  %v926_v32 = vld [vmem:[%s1366_s4] ss:$0 sm:$0xff]  ;;  %v844_v37 = vld [vmem:[#allocation8 + $0x38] sm:$0xff]  ;;  %vm520_vm4 = vcmp.lt.s32.totalorder %v404_v3, 64  ;;  %v843_v43 = vld [vmem:[#allocation8 + $0x30] sm:$0xff]  ;;  %p1075_p9 = scmp.lt.s32.totalorder %s1069_s23, %s1371_s9 }
  0x40   : > { %617 = vmatpush.bf16.msra.mxu1 %v844_v37  ;;  %v842_v44 = vld [vmem:[#allocation8 + $0x28] sm:$0xff]  ;;  %v841_v45 = vld [vmem:[#allocation8 + $0x20] sm:$0xff]  ;;  %v840_v46 = vld [vmem:[#allocation8 + $0x18] sm:$0xff]  ;;  %s1070_s22 = scalar_lea.hbm %s1069_s23, 8  ;;  %s1074_s26 = scalar_lea.hbm %s1371_s9, 16 }
  0x41   : > { %503 = vmatpush.bf16.msra.mxu0 %v835_v9  ;;  %v839_v47 = vld [vmem:[#allocation8 + $0x10] sm:$0xff]  ;;  %v838_v48 = vld [vmem:[#allocation8 + $0x8] sm:$0xff]  ;;  %v837_v49 = vld [vmem:[#allocation8] sm:$0xff]  ;;  %p1071_p1 = scmp.ne.s32.totalorder %s1069_s23, %s1070_s22  ;;  %p1076_p10 = scmp.lt.s32.totalorder %s1074_s26, %s1070_s22 }
  0x42   : > { %v927_v59 = vld [vmem:[%s1367_s5] ss:$0 sm:$0xff] }
  0x43   : > { %v928_v62 = vld [vmem:[%s1368_s6] ss:$0 sm:$0xff]  ;;  %p1072_p4 = pnand %p1071_p1, %p1267_p3  ;;  %p1077_p2 = por %p1076_p10, %p1075_p9 }
  0x44   : > { %618 = vmatpush.bf16.msra.mxu1 %v843_v43  ;;  %v929_v2 = vld [vmem:[%s1370_s8] ss:$0 sm:$0xff] }
  0x45   : > { %504 = vmatpush.bf16.msra.mxu0 %v834_v10  ;;  %p1073_p8 = pneg %p1072_p4 }
  0x47   : > { %p1078_p11 = pnand %p1077_p2, %p1073_p8 }
  0x48   : > { %619 = vmatpush.bf16.msra.mxu1 %v842_v44 }
  0x49   : > { %505 = vmatpush.bf16.msra.mxu0 %v833_v11 }
  0x4c   : > { %620 = vmatpush.bf16.msra.mxu1 %v841_v45 }
  0x4d   : > { %506 = vmatpush.bf16.msra.mxu0 %v832_v12 }
  0x50   : > { %621 = vmatpush.bf16.msra.mxu1 %v840_v46 }
  0x51   : > { %507 = vmatpush.bf16.msra.mxu0 %v831_v13 }
  0x54   : > { %622 = vmatpush.bf16.msra.mxu1 %v839_v47 }
  0x55   : > { %508 = vmatpush.bf16.msra.mxu0 %v830_v14 }
  0x58   : > { %623 = vmatpush.bf16.msra.mxu1 %v838_v48 }
  0x59   : > { %509 = vmatpush.bf16.msra.mxu0 %v829_v15 }
  0x5c   : > { %624 = vmatpush.bf16.msra.mxu1 %v837_v49 }
  0xaf   : > { %v400_v4 = vpop.xlane.xlu0 %399 }
  0xb0   : > { %v401_v5 = vmul.f32 0.03125, %v400_v4 }
  0xb2   : > { %v402_v6 = vsub.f32 %v398_v0, %v401_v5 }
  0xb4   : > { %v406_v7 = vsel %vm405_vm0, %v402_v6, 0.0 }
  0xb5   : > { %v407_v8 = vmul.f32 %v406_v7, %v406_v7 }
  0xb7   : > { %408 = vadd.xlane.f32.xlu0 %v407_v8 }
 0x12a   : > { %v409_v16 = vpop.xlane.xlu0 %408 }
 0x12b   : > { %v410_v17 = vmul.f32 0.03125, %v409_v16 }
 0x12d   : > { %v411_v18 = vadd.f32 1e-05, %v410_v17 }
 0x12f   : > { %930 = vrsqrt.f32 %v411_v18  ;;  %vm418_vm2 = vweird.f32 %v411_v18 }
 0x135   : > { %v931_v19 = vpop.eup %930 }
 0x136   : > { %v413_v20 = vmul.f32 %v931_v19, %v411_v18  ;;  %vm419_vm1 = vweird.f32 %v931_v19 }
 0x137   : > { %vm420_vm3 = vmor %vm418_vm2, %vm419_vm1 }
 0x138   : > { %v414_v21 = vmul.f32 %v931_v19, %v413_v20 }
 0x13a   : > { %v415_v22 = vmul.f32 0.5, %v414_v21 }
 0x13c   : > { %v416_v23 = vsub.f32 1.5, %v415_v22 }
 0x13e   : > { %v417_v24 = vmul.f32 %v931_v19, %v416_v23 }
 0x140   : > { %v421_v26 = vsel %vm420_vm3, %v931_v19, %v417_v24 }
 0x141   : > { %v422_v27 = vmul.f32 %v421_v26, %v406_v7 }
 0x143   : > { %v427_v29 = vmul.f32 %v924_v25, %v422_v27 }
 0x145   : > { %v432_v30 = vadd.f32 %v925_v28, %v427_v29 }
 0x147   : > { %v433_v31 = vpack.c.bf16 %v432_v30, %v432_v30 }
 0x149   : > { %510 = vmatmul.bf16.vlgmr.msra.gmra.mxu0 %v433_v31 }
 0x1c6   : > { %v511_v33 = vpop.f32.mrf.mxu0 }
 0x1c7   : > { %v512_v34 = vadd.f32 %v926_v32, %v511_v33 }
 0x1c9   : > { %v515_v35 = vmax.f32 %v512_v34, 0.0 }
 0x1cb   : > { %516 = vadd.xlane.f32.xlu1 %v515_v35 }
 0x1ce   : > { %v513_v36 = vpop.f32.mrf.mxu0 }
 0x23e   : > { %v517_v38 = vpop.xlane.xlu1 %516 }
 0x23f   : > { %v518_v39 = vmul.f32 0.015625, %v517_v38 }
 0x241   : > { %v519_v40 = vsub.f32 %v515_v35, %v518_v39 }
 0x243   : > { %v521_v41 = vsel %vm520_vm4, %v519_v40, 0.0 }
 0x244   : > { %v522_v42 = vmul.f32 %v521_v41, %v521_v41 }
 0x246   : > { %523 = vadd.xlane.f32.xlu1 %v522_v42 }
 0x2b9   : > { %v524_v50 = vpop.xlane.xlu1 %523 }
 0x2ba   : > { %v525_v51 = vmul.f32 0.015625, %v524_v50 }
 0x2bc   : > { %v526_v52 = vadd.f32 1e-05, %v525_v51 }
 0x2be   : > { %932 = vrsqrt.f32 %v526_v52  ;;  %vm533_vm6 = vweird.f32 %v526_v52 }
 0x2c4   : > { %v933_v53 = vpop.eup %932 }
 0x2c5   : > { %v528_v54 = vmul.f32 %v933_v53, %v526_v52  ;;  %vm534_vm5 = vweird.f32 %v933_v53 }
 0x2c6   : > { %vm535_vm7 = vmor %vm533_vm6, %vm534_vm5 }
 0x2c7   : > { %v529_v55 = vmul.f32 %v933_v53, %v528_v54 }
 0x2c9   : > { %v530_v56 = vmul.f32 0.5, %v529_v55 }
 0x2cb   : > { %v531_v57 = vsub.f32 1.5, %v530_v56 }
 0x2cd   : > { %v532_v58 = vmul.f32 %v933_v53, %v531_v57 }
 0x2cf   : > { %v536_v60 = vsel %vm535_vm7, %v933_v53, %v532_v58 }
 0x2d0   : > { %v537_v61 = vmul.f32 %v536_v60, %v521_v41 }
 0x2d2   : > { %v542_v63 = vmul.f32 %v927_v59, %v537_v61 }
 0x2d4   : > { %v547_v0 = vadd.f32 %v928_v62, %v542_v63 }
 0x2d6   : > { %v548_v1 = vpack.c.bf16 %v547_v0, %v547_v0 }
 0x2d8   : > { %625 = vmatmul.bf16.vlgmr.msra.gmra.mxu1 %v548_v1 }
 0x355   : > { %v626_v3 = vpop.f32.mrf.mxu1 }
 0x356   : > { %v627_v4 = vadd.f32 %v929_v2, %v626_v3 }
 0x358   : > { %v630_v5 = vmax.f32 %v627_v4, 0.0 }
 0x35a   : > { %631 = vst [vmem:[%s397_s7] sm:$0xff] %v630_v5 }
 0x35b   : > { %1081 = shalt.err (!%p1078_p11)
}
 0x35c   : > { %859 = dma.vmem_to_hbm [thread:$0]  (%p1267_p3), %s646_s15, 128, %s648_s20, %s633_s13  }
 0x35d   : > { %v628_v6 = vpop.f32.mrf.mxu1 }
 0x35e PF: > { %s659_s17 = sand.u32 1, %s1116_s30   ;;  %p1384_p12 = scmp.ge.s32.totalorder %s1128_s12, 2 }
 0x35f   : > { %s660_s21 = scalar_lea.sflag [#allocation4], %s659_s17 }
 0x360   : > { %p876_p13 = pnand %p1384_p12, %p1220_p6 }
 0x362   : > { %p877_p0 = pneg %p876_p13 }
 0x364   : > { %1111 = dma.done.wait (%p877_p0), %s660_s21, 128  }
 0x365   : > { %1113 = vsyncadd (%p877_p0), %s660_s21, 4294967168  ;;  %p24_p5 = scmp.ge.s32.totalorder %s1254_s19, 4   ;;  %s1385_s30 = smov %s1120_s10 }
 0x366   : > { %s1386_s10 = smov %s1124_s11  ;;  %s1387_s11 = smov %s1263_s25 }
 0x367   : > { %s1388_s12 = smov %s1254_s19  ;;  %26 = sbr.rel (!%p24_p5) target bundleno = 11 (0xb), region = 113 }
 0x36c   :  { %666 = vsyncpa [#allocation3], 1 }
 0x36d   :  { %668 = vsyncpa [#allocation3 + $0x1], 1 }
 0x36e   :  { %669 = vsyncpa [#allocation6], 1 }
 0x36f   :  { %670 = vsyncpa [#allocation9], 1 }
 0x370   :  { %671 = vsyncpa [#allocation4], 1 }
 0x371   :  { %673 = vsyncpa [#allocation4 + $0x1], 1 }

// kernel: tpu_custom_call.1
= control target key start
LH: loop header
LB: loop body
LE: loop exit
PB: predicated region body
PF: predicated region fallthrough
CT: control target
= control target key end

     0   :  { %s1362_s0 = inlined_call_operand.hbm [shape: f32[16,128], index: 0, kind: input, shape index: {}]   ;;  %s1363_s1 = inlined_call_operand.hbm [shape: f32[1,128], index: 1, kind: input, shape index: {}]   ;;  %s1364_s2 = inlined_call_operand.vmem [shape: f32[1,128], index: 2, kind: input, shape index: {}]   ;;  %s1365_s3 = inlined_call_operand.hbm [shape: bf16[128,128], index: 3, kind: input, shape index: {}]   ;;  %s1366_s4 = inlined_call_operand.vmem [shape: f32[1,128], index: 4, kind: input, shape index: {}]   ;;  %s1367_s5 = inlined_call_operand.vmem [shape: f32[1,128], index: 5, kind: input, shape index: {}]   ;;  %s1368_s6 = inlined_call_operand.vmem [shape: f32[1,128], index: 6, kind: input, shape index: {}]   ;;  %s1369_s7 = inlined_call_operand.hbm [shape: bf16[128,128], index: 7, kind: input, shape index: {}]   ;;  %s1370_s8 = inlined_call_operand.vmem [shape: f32[1,128], index: 8, kind: input, shape index: {}]   ;;  %s1371_s9 = inlined_call_operand.hbm [shape: f32[16,128], index: 9, kind: output, shape index: {}]  }
   0x1   :  { %1372 = sst [smem:[#allocation15_spill]] %s1363_s1 }
   0x2   :  { %1373 = sst [smem:[#allocation16_spill]] %s1365_s3 }
   0x3   :  { %1374 = sst [smem:[#allocation17_spill]] %s1369_s7 }
   0x4   :  { %14 = vsyncpa [#allocation3], 0 }
   0x5   :  { %16 = vsyncpa [#allocation3 + $0x1], 0 }
   0x6   :  { %17 = vsyncpa [#allocation6], 0 }
   0x7   :  { %18 = vsyncpa [#allocation9], 0 }
   0x8   :  { %19 = vsyncpa [#allocation4], 0 }
   0x9   :  { %21 = vsyncpa [#allocation4 + $0x1], 0  ;;  %s1185_s30 = smov 0   ;;  %s1187_s10 = smov 0  }
   0xa   :  { %s1189_s11 = smov 0   ;;  %s1191_s12 = smov 0  }
   0xb LB: > { %s1206_s13 = sadd.s32 4294967295, %s1128_s12   ;;  %s747_s14 = sadd.s32 4294967294, %s1128_s12   ;;  %s1128_s12 = sphi %s1191_s12, %s1388_s12   ;;  %s1124_s11 = sphi %s1189_s11, %s1387_s11   ;;  %s1120_s10 = sphi %s1187_s10, %s1386_s10   ;;  %s1116_s30 = sphi %s1185_s30, %s1385_s30  }
   0xc   : > { %p47_p0 = scmp.ne.s32.totalorder %s1120_s10, %s1116_s30  ;;  %p48_p1 = scmp.eq.s32.totalorder %s1206_s13, 0 }
   0xd   : > { %p239_p2 = scmp.eq.s32.totalorder %s1206_s13, 1  ;;  %p245_p3 = scmp.eq.s32.totalorder %s747_s14, 1 }
   0xe   : > { %p1215_p4 = por %p48_p1, %p47_p0  ;;  %p748_p5 = scmp.ge.s32.totalorder %s1128_s12, 1 }
   0xf   : > { %p1220_p6 = por %p245_p3, %p47_p0  ;;  %p252_p7 = scmp.lt.s32.totalorder %s1128_s12, 3 }
  0x10   : > { %s1377_s1 = sld [smem:[#allocation15_spill]]  ;;  %s1130_s21 = smov [#allocation5]  }
  0x11   : > { %p1228_p8 = pnand %p748_p5, %p252_p7  ;;  %s266_s22 = sshll.u32 %s1130_s21, 4  ;;  %s267_s22 = int_to_ptr.vmem [resolvable:$true] %s266_s22 }
  0x12   : > { %s1379_s3 = sld [smem:[#allocation16_spill]]  ;;  %s1131_s27 = smov [#allocation7]  }
  0x13   : > { %p861_p10 = pneg %p1228_p8  ;;  %s280_s28 = sshll.u32 %s1131_s27, 4  ;;  %s281_s28 = int_to_ptr.vmem [resolvable:$true] %s280_s28 }
  0x14   : > { %s1132_s29 = smov 64   ;;  %s1133_s14 = smov 4  }
  0x15   : > { %p1240_p11 = pnand %p861_p10, %p48_p1  ;;  %s1381_s7 = sld [smem:[#allocation17_spill]] }
  0x16   : > { %s264_s19 = sshll.u32 %s1377_s1, 4  ;;  %s1134_s23 = smov [#allocation8]   ;;  %s265_s19 = int_to_ptr.hbm [resolvable:$true] %s264_s19 }
  0x17   : > { %864 = dma.hbm_to_vmem [thread:$0]  (!%p1240_p11), %s265_s19, 16, %s267_s22, [#allocation6]  }
  0x18   : > { %s278_s25 = sshll.u32 %s1379_s3, 4  ;;  %s303_s24 = sshll.u32 %s1134_s23, 4  ;;  %s279_s25 = int_to_ptr.hbm [resolvable:$true] %s278_s25  ;;  %s304_s24 = int_to_ptr.vmem [resolvable:$true] %s303_s24 }
  0x19   : > { %867 = dma.hbm_to_vmem [thread:$0]  (!%p1240_p11), %s279_s25, 1024, %s281_s28, [#allocation6], %s1132_s29, %s1132_s29, %s1133_s14  }
  0x1a   : > { %s1254_s19 = sadd.s32 1, %s1128_s12   ;;  %s34_s27 = sadd.s32 1, %s1124_s11 }
  0x1b   : > { %s301_s21 = sshll.u32 %s1381_s7, 4  ;;  %s31_s22 = ssub.s32 %s1128_s12, %s1254_s19  ;;  %s302_s21 = int_to_ptr.hbm [resolvable:$true] %s301_s21 }
  0x1c   : > { %870 = dma.hbm_to_vmem [thread:$0]  (!%p1240_p11), %s302_s21, 1024, %s304_s24, [#allocation9], %s1132_s29, %s1132_s29, %s1133_s14  }
  0x1d   : > { %p32_p12 = scmp.eq.s32.totalorder %s31_s22, 0  ;;  %p41_p13 = scmp.ne.s32.totalorder %s1124_s11, %s1120_s10 }
  0x1e   : > { %p42_p0 = scmp.eq.s32.totalorder %s1128_s12, 0  ;;  %p882_p5 = scmp.lt.s32.totalorder %s1128_s12, 2 }
  0x1f   : > { %s1263_s25 = scalar_select %p32_p12, %s1124_s11, %s34_s27  }
  0x20   : > { %p1267_p3 = por %p239_p2, %p41_p13  ;;  %s320_s17 = sand.u32 1, %s1124_s11  }
  0x21   : > { %s754_s18 = sshll.u32 %s1128_s12, 3  ;;  %p43_p7 = por %p42_p0, %p41_p13 }
  0x22   : > { %s753_s26 = sshll.u32 %s320_s17, 3  ;;  %s328_s21 = scalar_lea.hbm %s1362_s0, %s754_s18 }
  0x23   : > { %s330_s23 = sshll.u32 %s328_s21, 4  ;;  %s324_s24 = scalar_lea.vmem [#allocation2], %s753_s26  ;;  %s331_s23 = int_to_ptr.hbm [resolvable:$true] %s330_s23 }
  0x24   : > { %s332_s22 = sshll.u32 %s324_s24, 4  ;;  %p1277_p10 = pnand %p882_p5, %p43_p7  ;;  %s333_s22 = int_to_ptr.vmem [resolvable:$true] %s332_s22 }
  0x25   : > { %s321_s1 = scalar_lea.sflag [#allocation3], %s320_s17  ;;  %s1024_s3 = sshra.s32 %s331_s23, 4  ;;  %s1025_s3 = int_to_ptr.hbm [resolvable:$true] %s1024_s3 }
  0x26   : > { %s1026_s7 = scalar_lea.hbm %s1025_s3, 8  ;;  %p1028_p11 = pneg %p1277_p10 }
  0x27   : > { %p1027_p2 = scmp.ne.s32.totalorder %s1025_s3, %s1026_s7  ;;  %s1031_s26 = scalar_lea.hbm %s1362_s0, 16 }
  0x28   : > { %p1032_p0 = scmp.lt.s32.totalorder %s1025_s3, %s1362_s0  ;;  %p1033_p5 = scmp.lt.s32.totalorder %s1031_s26, %s1026_s7 }
  0x29   : > { %p1029_p12 = pnand %p1028_p11, %p1027_p2 }
  0x2a   : > { %p1034_p7 = por %p1033_p5, %p1032_p0 }
  0x2b   : > { %p1030_p13 = pneg %p1029_p12 }
  0x2d   : > { %p1035_p9 = pnand %p1034_p7, %p1030_p13 }
  0x2f   : > { %1038 = shalt.err (!%p1035_p9)
}
  0x30   : > { %874 = dma.hbm_to_vmem [thread:$0]  (!%p1277_p10), %s331_s23, 128, %s333_s22, %s321_s1  }
  0x31   : > { %341 = sbr.rel (%p1228_p8) target bundleno = 862 (0x35e), region = 56  ;;  %s1294_s17 = sand.u32 (!%p1228_p8), 1, %s1120_s10  }
  0x32   : > { %s756_s24 = sshll.u32 (!%p1228_p8), %s1294_s17, 3  ;;  %s344_s18 = scalar_lea.sflag (!%p1228_p8), [#allocation3], %s1294_s17 }
  0x33   : > { %s347_s3 = scalar_lea.vmem (!%p1228_p8), [#allocation2], %s756_s24 }
  0x36   : > { %1099 = dma.done.wait (%p1215_p4), %s344_s18, 128  }
  0x37   : > { %1101 = vsyncadd (%p1215_p4), %s344_s18, 4294967168 }
  0x38   : > { %1103 = dma.done.wait (%p48_p1), [#allocation6], 1040  }
  0x39   : > { %1105 = vsyncadd (%p48_p1), [#allocation6], 4294966256 }
  0x3a   : > { %1107 = dma.done.wait (%p48_p1), [#allocation9], 1024  }
  0x3b   : > { %1109 = vsyncadd (%p48_p1), [#allocation9], 4294966272  ;;  %v398_v0 = vld [vmem:[%s347_s3] sm:$0xff]  ;;  %v403_v2 = vlaneseq  ;;  %v833_v11 = vld [vmem:[#allocation7 + $0x20] sm:$0xff]  ;;  %s826_s26 = sshll.u32 %s1206_s13, 3  ;;  %s397_s7 = scalar_lea.vmem [#allocation10], %s756_s24 }
  0x3c   : > { %399 = vadd.xlane.f32.xlu0 %v398_v0  ;;  %v836_v1 = vld [vmem:[#allocation7 + $0x38] sm:$0xff]  ;;  %v835_v9 = vld [vmem:[#allocation7 + $0x30] sm:$0xff]  ;;  %v834_v10 = vld [vmem:[#allocation7 + $0x28] sm:$0xff]  ;;  %s643_s1 = scalar_lea.hbm %s1371_s9, %s826_s26  ;;  %s645_s15 = sshll.u32 %s397_s7, 4  ;;  %s646_s15 = int_to_ptr.vmem [resolvable:$true] %s645_s15 }
  0x3d   : > { %502 = vmatpush.bf16.msra.mxu0 %v836_v1  ;;  %v404_v3 = vand.u32 127, %v403_v2  ;;  %v832_v12 = vld [vmem:[#allocation7 + $0x18] sm:$0xff]  ;;  %v831_v13 = vld [vmem:[#allocation7 + $0x10] sm:$0xff]  ;;  %v830_v14 = vld [vmem:[#allocation7 + $0x8] sm:$0xff]  ;;  %s647_s20 = sshll.u32 %s643_s1, 4  ;;  %s633_s13 = scalar_lea.sflag [#allocation4], %s1294_s17  ;;  %s648_s20 = int_to_ptr.hbm [resolvable:$true] %s647_s20 }
  0x3e   : > { %v829_v15 = vld [vmem:[#allocation7] sm:$0xff]  ;;  %v924_v25 = vld [vmem:[#allocation5] ss:$0 sm:$0xff]  ;;  %v925_v28 = vld [vmem:[%s1364_s2] ss:$0 sm:$0xff]  ;;  %s1068_s23 = sshra.s32 %s648_s20, 4  ;;  %s1069_s23 = int_to_ptr.hbm [resolvable:$true] %s1068_s23 }
  0x3f   : > { %vm405_vm0 = vcmp.lt.s32.totalorder %v404_v3, 32  ;;  %v926_v32 = vld [vmem:[%s1366_s4] ss:$0 sm:$0xff]  ;;  %v844_v37 = vld [vmem:[#allocation8 + $0x38] sm:$0xff]  ;;  %vm520_vm4 = vcmp.lt.s32.totalorder %v404_v3, 64  ;;  %v843_v43 = vld [vmem:[#allocation8 + $0x30] sm:$0xff]  ;;  %p1075_p9 = scmp.lt.s32.totalorder %s1069_s23, %s1371_s9 }
  0x40   : > { %617 = vmatpush.bf16.msra.mxu1 %v844_v37  ;;  %v842_v44 = vld [vmem:[#allocation8 + $0x28] sm:$0xff]  ;;  %v841_v45 = vld [vmem:[#allocation8 + $0x20] sm:$0xff]  ;;  %v840_v46 = vld [vmem:[#allocation8 + $0x18] sm:$0xff]  ;;  %s1070_s22 = scalar_lea.hbm %s1069_s23, 8  ;;  %s1074_s26 = scalar_lea.hbm %s1371_s9, 16 }
  0x41   : > { %503 = vmatpush.bf16.msra.mxu0 %v835_v9  ;;  %v839_v47 = vld [vmem:[#allocation8 + $0x10] sm:$0xff]  ;;  %v838_v48 = vld [vmem:[#allocation8 + $0x8] sm:$0xff]  ;;  %v837_v49 = vld [vmem:[#allocation8] sm:$0xff]  ;;  %p1071_p1 = scmp.ne.s32.totalorder %s1069_s23, %s1070_s22  ;;  %p1076_p10 = scmp.lt.s32.totalorder %s1074_s26, %s1070_s22 }
  0x42   : > { %v927_v59 = vld [vmem:[%s1367_s5] ss:$0 sm:$0xff] }
  0x43   : > { %v928_v62 = vld [vmem:[%s1368_s6] ss:$0 sm:$0xff]  ;;  %p1072_p4 = pnand %p1071_p1, %p1267_p3  ;;  %p1077_p2 = por %p1076_p10, %p1075_p9 }
  0x44   : > { %618 = vmatpush.bf16.msra.mxu1 %v843_v43  ;;  %v929_v2 = vld [vmem:[%s1370_s8] ss:$0 sm:$0xff] }
  0x45   : > { %504 = vmatpush.bf16.msra.mxu0 %v834_v10  ;;  %p1073_p8 = pneg %p1072_p4 }
  0x47   : > { %p1078_p11 = pnand %p1077_p2, %p1073_p8 }
  0x48   : > { %619 = vmatpush.bf16.msra.mxu1 %v842_v44 }
  0x49   : > { %505 = vmatpush.bf16.msra.mxu0 %v833_v11 }
  0x4c   : > { %620 = vmatpush.bf16.msra.mxu1 %v841_v45 }
  0x4d   : > { %506 = vmatpush.bf16.msra.mxu0 %v832_v12 }
  0x50   : > { %621 = vmatpush.bf16.msra.mxu1 %v840_v46 }
  0x51   : > { %507 = vmatpush.bf16.msra.mxu0 %v831_v13 }
  0x54   : > { %622 = vmatpush.bf16.msra.mxu1 %v839_v47 }
  0x55   : > { %508 = vmatpush.bf16.msra.mxu0 %v830_v14 }
  0x58   : > { %623 = vmatpush.bf16.msra.mxu1 %v838_v48 }
  0x59   : > { %509 = vmatpush.bf16.msra.mxu0 %v829_v15 }
  0x5c   : > { %624 = vmatpush.bf16.msra.mxu1 %v837_v49 }
  0xaf   : > { %v400_v4 = vpop.xlane.xlu0 %399 }
  0xb0   : > { %v401_v5 = vmul.f32 0.03125, %v400_v4 }
  0xb2   : > { %v402_v6 = vsub.f32 %v398_v0, %v401_v5 }
  0xb4   : > { %v406_v7 = vsel %vm405_vm0, %v402_v6, 0.0 }
  0xb5   : > { %v407_v8 = vmul.f32 %v406_v7, %v406_v7 }
  0xb7   : > { %408 = vadd.xlane.f32.xlu0 %v407_v8 }
 0x12a   : > { %v409_v16 = vpop.xlane.xlu0 %408 }
 0x12b   : > { %v410_v17 = vmul.f32 0.03125, %v409_v16 }
 0x12d   : > { %v411_v18 = vadd.f32 1e-05, %v410_v17 }
 0x12f   : > { %930 = vrsqrt.f32 %v411_v18  ;;  %vm418_vm2 = vweird.f32 %v411_v18 }
 0x135   : > { %v931_v19 = vpop.eup %930 }
 0x136   : > { %v413_v20 = vmul.f32 %v931_v19, %v411_v18  ;;  %vm419_vm1 = vweird.f32 %v931_v19 }
 0x137   : > { %vm420_vm3 = vmor %vm418_vm2, %vm419_vm1 }
 0x138   : > { %v414_v21 = vmul.f32 %v931_v19, %v413_v20 }
 0x13a   : > { %v415_v22 = vmul.f32 0.5, %v414_v21 }
 0x13c   : > { %v416_v23 = vsub.f32 1.5, %v415_v22 }
 0x13e   : > { %v417_v24 = vmul.f32 %v931_v19, %v416_v23 }
 0x140   : > { %v421_v26 = vsel %vm420_vm3, %v931_v19, %v417_v24 }
 0x141   : > { %v422_v27 = vmul.f32 %v421_v26, %v406_v7 }
 0x143   : > { %v427_v29 = vmul.f32 %v924_v25, %v422_v27 }
 0x145   : > { %v432_v30 = vadd.f32 %v925_v28, %v427_v29 }
 0x147   : > { %v433_v31 = vpack.c.bf16 %v432_v30, %v432_v30 }
 0x149   : > { %510 = vmatmul.bf16.vlgmr.msra.gmra.mxu0 %v433_v31 }
 0x1c6   : > { %v511_v33 = vpop.f32.mrf.mxu0 }
 0x1c7   : > { %v512_v34 = vadd.f32 %v926_v32, %v511_v33 }
 0x1c9   : > { %v515_v35 = vmax.f32 %v512_v34, 0.0 }
 0x1cb   : > { %516 = vadd.xlane.f32.xlu1 %v515_v35 }
 0x1ce   : > { %v513_v36 = vpop.f32.mrf.mxu0 }
 0x23e   : > { %v517_v38 = vpop.xlane.xlu1 %516 }
 0x23f   : > { %v518_v39 = vmul.f32 0.015625, %v517_v38 }
 0x241   : > { %v519_v40 = vsub.f32 %v515_v35, %v518_v39 }
 0x243   : > { %v521_v41 = vsel %vm520_vm4, %v519_v40, 0.0 }
 0x244   : > { %v522_v42 = vmul.f32 %v521_v41, %v521_v41 }
 0x246   : > { %523 = vadd.xlane.f32.xlu1 %v522_v42 }
 0x2b9   : > { %v524_v50 = vpop.xlane.xlu1 %523 }
 0x2ba   : > { %v525_v51 = vmul.f32 0.015625, %v524_v50 }
 0x2bc   : > { %v526_v52 = vadd.f32 1e-05, %v525_v51 }
 0x2be   : > { %932 = vrsqrt.f32 %v526_v52  ;;  %vm533_vm6 = vweird.f32 %v526_v52 }
 0x2c4   : > { %v933_v53 = vpop.eup %932 }
 0x2c5   : > { %v528_v54 = vmul.f32 %v933_v53, %v526_v52  ;;  %vm534_vm5 = vweird.f32 %v933_v53 }
 0x2c6   : > { %vm535_vm7 = vmor %vm533_vm6, %vm534_vm5 }
 0x2c7   : > { %v529_v55 = vmul.f32 %v933_v53, %v528_v54 }
 0x2c9   : > { %v530_v56 = vmul.f32 0.5, %v529_v55 }
 0x2cb   : > { %v531_v57 = vsub.f32 1.5, %v530_v56 }
 0x2cd   : > { %v532_v58 = vmul.f32 %v933_v53, %v531_v57 }
 0x2cf   : > { %v536_v60 = vsel %vm535_vm7, %v933_v53, %v532_v58 }
 0x2d0   : > { %v537_v61 = vmul.f32 %v536_v60, %v521_v41 }
 0x2d2   : > { %v542_v63 = vmul.f32 %v927_v59, %v537_v61 }
 0x2d4   : > { %v547_v0 = vadd.f32 %v928_v62, %v542_v63 }
 0x2d6   : > { %v548_v1 = vpack.c.bf16 %v547_v0, %v547_v0 }
 0x2d8   : > { %625 = vmatmul.bf16.vlgmr.msra.gmra.mxu1 %v548_v1 }
 0x355   : > { %v626_v3 = vpop.f32.mrf.mxu1 }
 0x356   : > { %v627_v4 = vadd.f32 %v929_v2, %v626_v3 }
 0x358   : > { %v630_v5 = vmax.f32 %v627_v4, 0.0 }
 0x35a   : > { %631 = vst [vmem:[%s397_s7] sm:$0xff] %v630_v5 }
 0x35b   : > { %1081 = shalt.err (!%p1078_p11)
}
 0x35c   : > { %859 = dma.vmem_to_hbm [thread:$0]  (%p1267_p3), %s646_s15, 128, %s648_s20, %s633_s13  }
 0x35d   : > { %v628_v6 = vpop.f32.mrf.mxu1 }
 0x35e PF: > { %s659_s17 = sand.u32 1, %s1116_s30   ;;  %p1384_p12 = scmp.ge.s32.totalorder %s1128_s12, 2 }
 0x35f   : > { %s660_s21 = scalar_lea.sflag [#allocation4], %s659_s17 }
 0x360   : > { %p876_p13 = pnand %p1384_p12, %p1220_p6 }
 0x362   : > { %p877_p0 = pneg %p876_p13 }
 0x364   : > { %1111 = dma.done.wait (%p877_p0), %s660_s21, 128  }
 0x365   : > { %1113 = vsyncadd (%p877_p0), %s660_s21, 4294967168  ;;  %p24_p5 = scmp.ge.s32.totalorder %s1254_s19, 4   ;;  %s1385_s30 = smov %s1120_s10 }
 0x366   : > { %s1386_s10 = smov %s1124_s11  ;;  %s1387_s11 = smov %s1263_s25 }
 0x367   : > { %s1388_s12 = smov %s1254_s19  ;;  %26 = sbr.rel (!%p24_p5) target bundleno = 11 (0xb), region = 113 }
 0x36c   :  { %666 = vsyncpa [#allocation3], 1 }
 0x36d   :  { %668 = vsyncpa [#allocation3 + $0x1], 1 }
 0x36e   :  { %669 = vsyncpa [#allocation6], 1 }
 0x36f   :  { %670 = vsyncpa [#allocation9], 1 }
 0x370   :  { %671 = vsyncpa [#allocation4], 1 }
 0x371   :  { %673 = vsyncpa [#allocation4 + $0x1], 1 }

</bundles_post_ra>
